<compile_context>
chip_gen: v7x
topology: tpu7x:2x2x1
jax: 0.10.0
libtpu: 0.0.40
codegen_flags: <defaults>
</compile_context>

<pallas_src>
import functools
import math

import jax
import jax.numpy as jnp
from jax.experimental import pallas as pl
from jax.experimental.pallas import tpu as pltpu

NEG_INF_FILL = -1000000000.0  # matches torch masked_fill_(..., -1e9)


# --------------------------------- kernel -----------------------------------

def _sdpa_kernel(*refs, scale, has_mask, mxu_dtype):
    """One (batch*head, q-tile) step: scores -> masked softmax -> context."""
    if has_mask:
        q_ref, k_ref, v_ref, m_ref, ctx_ref, attn_ref = refs
    else:
        q_ref, k_ref, v_ref, ctx_ref, attn_ref = refs
        m_ref = None

    # Blocks are (1, tq, Dk) / (1, Lk, Dk) / ... ; index [0] -> 2-D tiles.
    # Scale Q before the matmul (Lq*Dk mults, not Lq*Lk).
    q = (q_ref[0].astype(jnp.float32) * scale).astype(mxu_dtype)   # (tq, Dk)
    k = k_ref[0].astype(mxu_dtype)                                 # (Lk, Dk)

    s = jnp.dot(q, k.T, preferred_element_type=jnp.float32)        # (tq, Lk)

    if has_mask:
        s = jnp.where(m_ref[0] != 0, jnp.float32(NEG_INF_FILL), s)

    # Numerically stable, *exact* softmax in f32 (no approx reciprocal).
    s = s - jnp.max(s, axis=-1, keepdims=True)
    e = jnp.exp(s)
    a = e / jnp.sum(e, axis=-1, keepdims=True)

    attn_ref[0] = a.astype(attn_ref.dtype)

    v = v_ref[0].astype(mxu_dtype)                                 # (Lk, Dv)
    ctx = jnp.dot(a.astype(mxu_dtype), v,
                  preferred_element_type=jnp.float32)              # (tq, Dv)
    ctx_ref[0] = ctx.astype(ctx_ref.dtype)


# --------------------------------- wrapper -----------------------------------

def _pick_q_tile(Lq):
    # 256-wide q tiles feed the 256-wide MXU on v6e/v7x; 128 still fine on
    # v5e; otherwise fall back to the full (small / irregular) Lq.
    for t in (256, 128):
        if Lq % t == 0:
            return t
    return Lq


def scaled_dot_product_attention(q, k, v, attn_mask=None, *, use_bf16=False):
    """Q/K: [B, H, Lq/Lk, Dk], V: [B, H, Lk, Dv], attn_mask broadcastable to
    [B, H, Lq, Lk] (True/nonzero = masked out).

    Returns (context [B, H, Lq, Dv], attn [B, H, Lq, Lk]) like the PyTorch module.
    """
    B, H, Lq, Dk = q.shape
    Lk = k.shape[2]
    Dv = v.shape[3]
    BH = B * H

    qf = q.reshape(BH, Lq, Dk)
    kf = k.reshape(BH, Lk, Dk)
    vf = v.reshape(BH, Lk, Dv)

    tq = _pick_q_tile(Lq)
    n_qt = Lq // tq
    grid = (BH, n_qt)

    inputs = [qf, kf, vf]
    in_specs = [
        pl.BlockSpec((1, tq, Dk), lambda b, i: (b, i, 0)),
        # K/V index_map ignores the q-tile axis -> stays resident across q tiles.
        pl.BlockSpec((1, Lk, Dk), lambda b, i: (b, 0, 0)),
        pl.BlockSpec((1, Lk, Dv), lambda b, i: (b, 0, 0)),
    ]

    has_mask = attn_mask is not None
    if has_mask:
        # Accept broadcastable masks; ship as int8 (4x less HBM traffic than f32).
        mf = jnp.broadcast_to(attn_mask, (B, H, Lq, Lk)).reshape(BH, Lq, Lk)
        mf = mf.astype(jnp.int8)
        inputs.append(mf)
        in_specs.append(pl.BlockSpec((1, tq, Lk), lambda b, i: (b, i, 0)))

    kernel = functools.partial(
        _sdpa_kernel,
        scale=1.0 / math.sqrt(Dk),
        has_mask=has_mask,
        mxu_dtype=jnp.bfloat16 if use_bf16 else jnp.float32,
    )

    ctx_f, attn_f = pl.pallas_call(
        kernel,
        grid=grid,
        out_shape=(
            jax.ShapeDtypeStruct((BH, Lq, Dv), q.dtype),
            jax.ShapeDtypeStruct((BH, Lq, Lk), jnp.float32),
        ),
        in_specs=in_specs,
        out_specs=(
            pl.BlockSpec((1, tq, Dv), lambda b, i: (b, i, 0)),
            pl.BlockSpec((1, tq, Lk), lambda b, i: (b, i, 0)),
        ),
        compiler_params=pltpu.CompilerParams(
            dimension_semantics=("parallel", "parallel"),
            vmem_limit_bytes=48 * 1024 * 1024,
        ),
    )(*inputs)

    return ctx_f.reshape(B, H, Lq, Dv), attn_f.reshape(B, H, Lq, Lk)


# ------------------------------ pure-JAX reference ----------------------------

def _sdpa_reference(q, k, v, attn_mask=None):
    with jax.default_matmul_precision("highest"):
        scores = jnp.einsum("bhqd,bhkd->bhqk", q, k) / math.sqrt(q.shape[-1])
        if attn_mask is not None:
            scores = jnp.where(attn_mask, jnp.float32(NEG_INF_FILL), scores)
        attn = jax.nn.softmax(scores, axis=-1)
        ctx = jnp.einsum("bhqk,bhkd->bhqd", attn, v)
    return ctx, attn


# ----------------------------------- main ------------------------------------

if __name__ == "__main__":
    B, H, S, Dk, Dv = 2, 4, 8, 8, 8  # d_model = H * Dk = 32

    key = jax.random.PRNGKey(0)
    kq, kk, kv = jax.random.split(key, 3)
    Q = jax.random.normal(kq, (B, H, S, Dk), jnp.float32)
    K = jax.random.normal(kk, (B, H, S, Dk), jnp.float32)
    V = jax.random.normal(kv, (B, H, S, Dv), jnp.float32)

    # Key-padding style mask: last key position masked out for every query/head.
    attn_mask = jnp.zeros((B, H, S, S), jnp.bool_).at[:, :, :, -1].set(True)

    # --- masked, f32 MXU path ---
    ctx, attn = scaled_dot_product_attention(Q, K, V, attn_mask)
    jax.block_until_ready((ctx, attn))
    ctx_ref, attn_ref = _sdpa_reference(Q, K, V, attn_mask)
    assert ctx.shape == (B, H, S, Dv) and attn.shape == (B, H, S, S)
    assert bool(jnp.all(jnp.isfinite(ctx))) and bool(jnp.all(jnp.isfinite(attn)))
    assert bool(jnp.allclose(ctx, ctx_ref, rtol=1e-2, atol=1e-2)), "ctx mismatch (masked)"
    assert bool(jnp.allclose(attn, attn_ref, rtol=1e-2, atol=1e-2)), "attn mismatch (masked)"
    assert bool(jnp.allclose(jnp.sum(attn, axis=-1), 1.0, atol=1e-3)), "softmax rows != 1"
    assert bool(jnp.allclose(attn[..., -1], 0.0, atol=1e-6)), "masked key weight != 0"

    # --- no-mask, f32 MXU path ---
    ctx2, attn2 = scaled_dot_product_attention(Q, K, V, None)
    jax.block_until_ready((ctx2, attn2))
    ctx2_ref, attn2_ref = _sdpa_reference(Q, K, V, None)
    assert bool(jnp.allclose(ctx2, ctx2_ref, rtol=1e-2, atol=1e-2)), "ctx mismatch (no mask)"
    assert bool(jnp.allclose(attn2, attn2_ref, rtol=1e-2, atol=1e-2)), "attn mismatch (no mask)"

    # --- masked, bf16 MXU operands (f32 accumulation / f32 softmax) ---
    ctx3, attn3 = scaled_dot_product_attention(Q, K, V, attn_mask, use_bf16=True)
    jax.block_until_ready((ctx3, attn3))
    assert bool(jnp.allclose(ctx3, ctx_ref, rtol=5e-2, atol=5e-2)), "ctx mismatch (bf16)"
    assert bool(jnp.allclose(attn3, attn_ref, rtol=5e-2, atol=5e-2)), "attn mismatch (bf16)"
    assert bool(jnp.allclose(jnp.sum(attn3, axis=-1), 1.0, atol=1e-3)), "bf16 softmax rows != 1"

    print("KERNEL_OK")
</pallas_src>

<mosaic_0001>
module attributes {stable_mosaic.version = 11 : i64} {
  func.func @_sdpa_kernel(%arg0: i32, %arg1: i32, %arg2: memref<1x8x8xf32, #tpu.memory_space<vmem>>, %arg3: memref<1x8x8xf32, #tpu.memory_space<vmem>>, %arg4: memref<1x8x8xf32, #tpu.memory_space<vmem>>, %arg5: memref<1x8x8xi8, #tpu.memory_space<vmem>>, %arg6: memref<1x8x8xf32, #tpu.memory_space<vmem>>, %arg7: memref<1x8x8xf32, #tpu.memory_space<vmem>>) attributes {dimension_semantics = [#tpu.dimension_semantics<parallel>, #tpu.dimension_semantics<parallel>], iteration_bounds = array<i64: 8, 1>, scalar_prefetch = 0 : i64, scratch_operands = 0 : i64, tpu.core_type = #tpu.core_type<tc>, window_params = [{transform_indices = @transform_0, window_bounds = array<i64: 1, 8, 8>}, {transform_indices = @transform_1, window_bounds = array<i64: 1, 8, 8>}, {transform_indices = @transform_2, window_bounds = array<i64: 1, 8, 8>}, {transform_indices = @transform_3, window_bounds = array<i64: 1, 8, 8>}, {transform_indices = @transform_4, window_bounds = array<i64: 1, 8, 8>}, {transform_indices = @transform_5, window_bounds = array<i64: 1, 8, 8>}]} {
    %c0 = arith.constant 0 : index
    %c0_0 = arith.constant 0 : index
    %c0_1 = arith.constant 0 : index
    %0 = vector.load %arg2[%c0, %c0_0, %c0_1] : memref<1x8x8xf32, #tpu.memory_space<vmem>>, vector<1x8x8xf32>
    %1 = vector.shape_cast %0 : vector<1x8x8xf32> to vector<8x8xf32>
    %cst = arith.constant 0.353553385 : f32
    %2 = vector.broadcast %cst : f32 to vector<8x8xf32>
    %3 = arith.mulf %1, %2 : vector<8x8xf32>
    %c0_2 = arith.constant 0 : index
    %c0_3 = arith.constant 0 : index
    %c0_4 = arith.constant 0 : index
    %4 = vector.load %arg3[%c0_2, %c0_3, %c0_4] : memref<1x8x8xf32, #tpu.memory_space<vmem>>, vector<1x8x8xf32>
    %5 = vector.shape_cast %4 : vector<1x8x8xf32> to vector<8x8xf32>
    %6 = tpu.transpose %5, [1, 0] : vector<8x8xf32> -> vector<8x8xf32>
    %cst_5 = arith.constant dense<0.000000e+00> : vector<8x8xf32>
    %7 = tpu.matmul %3, %6, %cst_5 {dimension_numbers = #tpu.dot_dimension_numbers<[1], [0], [0], [1], [0, 0, 1, 1], [], []>} : vector<8x8xf32>, vector<8x8xf32>, vector<8x8xf32> -> vector<8x8xf32>
    %c0_6 = arith.constant 0 : index
    %c0_7 = arith.constant 0 : index
    %c0_8 = arith.constant 0 : index
    %8 = vector.load %arg5[%c0_6, %c0_7, %c0_8] : memref<1x8x8xi8, #tpu.memory_space<vmem>>, vector<1x8x8xi8>
    %9 = vector.shape_cast %8 : vector<1x8x8xi8> to vector<8x8xi8>
    %c0_i8 = arith.constant 0 : i8
    %10 = vector.broadcast %c0_i8 : i8 to vector<8x8xi8>
    %11 = arith.cmpi ne, %9, %10 : vector<8x8xi8>
    %cst_9 = arith.constant -1.000000e+09 : f32
    %12 = vector.broadcast %cst_9 : f32 to vector<8x8xf32>
    %13 = arith.select %11, %12, %7 : vector<8x8xi1>, vector<8x8xf32>
    %cst_10 = arith.constant dense<0xFF800000> : vector<8xf32>
    %14 = vector.multi_reduction <maximumf>, %13, %cst_10 [1] : vector<8x8xf32> to vector<8xf32>
    %15 = vector.shape_cast %14 : vector<8xf32> to vector<8x1xf32>
    %16 = vector.broadcast %15 : vector<8x1xf32> to vector<8x8xf32>
    %17 = arith.subf %13, %16 : vector<8x8xf32>
    %18 = math.exp %17 : vector<8x8xf32>
    %cst_11 = arith.constant dense<0.000000e+00> : vector<8xf32>
    %19 = vector.multi_reduction <add>, %18, %cst_11 [1] : vector<8x8xf32> to vector<8xf32>
    %20 = vector.shape_cast %19 : vector<8xf32> to vector<8x1xf32>
    %21 = vector.broadcast %20 : vector<8x1xf32> to vector<8x8xf32>
    %22 = arith.divf %18, %21 : vector<8x8xf32>
    %c0_12 = arith.constant 0 : index
    %c0_13 = arith.constant 0 : index
    %c0_14 = arith.constant 0 : index
    %23 = vector.load %arg7[%c0_12, %c0_13, %c0_14] : memref<1x8x8xf32, #tpu.memory_space<vmem>>, vector<1x8x8xf32>
    %24 = vector.shape_cast %23 : vector<1x8x8xf32> to vector<8x8xf32>
    %25 = vector.shape_cast %22 : vector<8x8xf32> to vector<1x8x8xf32>
    tpu.vector_store %arg7[%c0_12, %c0_13, %c0_14], %25 {strides = array<i32>} : memref<1x8x8xf32, #tpu.memory_space<vmem>>, vector<1x8x8xf32>,
    %c0_15 = arith.constant 0 : index
    %c0_16 = arith.constant 0 : index
    %c0_17 = arith.constant 0 : index
    %26 = vector.load %arg4[%c0_15, %c0_16, %c0_17] : memref<1x8x8xf32, #tpu.memory_space<vmem>>, vector<1x8x8xf32>
    %27 = vector.shape_cast %26 : vector<1x8x8xf32> to vector<8x8xf32>
    %cst_18 = arith.constant dense<0.000000e+00> : vector<8x8xf32>
    %28 = tpu.matmul %22, %27, %cst_18 {dimension_numbers = #tpu.dot_dimension_numbers<[1], [0], [0], [1], [0, 0, 1, 1], [], []>} : vector<8x8xf32>, vector<8x8xf32>, vector<8x8xf32> -> vector<8x8xf32>
    %c0_19 = arith.constant 0 : index
    %c0_20 = arith.constant 0 : index
    %c0_21 = arith.constant 0 : index
    %29 = vector.load %arg6[%c0_19, %c0_20, %c0_21] : memref<1x8x8xf32, #tpu.memory_space<vmem>>, vector<1x8x8xf32>
    %30 = vector.shape_cast %29 : vector<1x8x8xf32> to vector<8x8xf32>
    %31 = vector.shape_cast %28 : vector<8x8xf32> to vector<1x8x8xf32>
    tpu.vector_store %arg6[%c0_19, %c0_20, %c0_21], %31 {strides = array<i32>} : memref<1x8x8xf32, #tpu.memory_space<vmem>>, vector<1x8x8xf32>,
    return
  }
  func.func @transform_0(%arg0: i32, %arg1: i32) -> (i32, i32, i32) {
    %c0_i32 = arith.constant 0 : i32
    %c0_i32_0 = arith.constant 0 : i32
    return %arg0, %arg1, %c0_i32 : i32, i32, i32
  }
  func.func @transform_1(%arg0: i32, %arg1: i32) -> (i32, i32, i32) {
    %c0_i32 = arith.constant 0 : i32
    %c0_i32_0 = arith.constant 0 : i32
    %c0_i32_1 = arith.constant 0 : i32
    return %arg0, %c0_i32, %c0_i32_0 : i32, i32, i32
  }
  func.func @transform_2(%arg0: i32, %arg1: i32) -> (i32, i32, i32) {
    %c0_i32 = arith.constant 0 : i32
    %c0_i32_0 = arith.constant 0 : i32
    %c0_i32_1 = arith.constant 0 : i32
    return %arg0, %c0_i32, %c0_i32_0 : i32, i32, i32
  }
  func.func @transform_3(%arg0: i32, %arg1: i32) -> (i32, i32, i32) {
    %c0_i32 = arith.constant 0 : i32
    %c0_i32_0 = arith.constant 0 : i32
    return %arg0, %arg1, %c0_i32 : i32, i32, i32
  }
  func.func @transform_4(%arg0: i32, %arg1: i32) -> (i32, i32, i32) {
    %c0_i32 = arith.constant 0 : i32
    %c0_i32_0 = arith.constant 0 : i32
    return %arg0, %arg1, %c0_i32 : i32, i32, i32
  }
  func.func @transform_5(%arg0: i32, %arg1: i32) -> (i32, i32, i32) {
    %c0_i32 = arith.constant 0 : i32
    %c0_i32_0 = arith.constant 0 : i32
    return %arg0, %arg1, %c0_i32 : i32, i32, i32
  }
}

</mosaic_0001>

<bundles_post_ra>
// kernel: tpu_custom_call.1
= control target key start
LH: loop header
LB: loop body
LE: loop exit
PB: predicated region body
PF: predicated region fallthrough
CT: control target
= control target key end

     0   :  { %s1516_s0 = inlined_call_operand.hbm [shape: f32[8,8,8], index: 0, kind: input, shape index: {}]   ;;  %s1517_s1 = inlined_call_operand.hbm [shape: f32[8,8,8], index: 1, kind: input, shape index: {}]   ;;  %s1518_s2 = inlined_call_operand.hbm [shape: f32[8,8,8], index: 2, kind: input, shape index: {}]   ;;  %s1519_s3 = inlined_call_operand.hbm [shape: s8[8,8,8], index: 3, kind: input, shape index: {}]   ;;  %s1520_s4 = inlined_call_operand.hbm [shape: f32[8,8,8], index: 4, kind: output, shape index: {0}]   ;;  %s1521_s5 = inlined_call_operand.hbm [shape: f32[8,8,8], index: 5, kind: output, shape index: {1}]  }
   0x1   :  { %1532 = sst [smem:[#allocation24_spill]] %s1517_s1 }
   0x2   :  { %11 = vsyncpa [#allocation3], 0 }
   0x3   :  { %13 = vsyncpa [#allocation3 + $0x1], 0 }
   0x4   :  { %14 = vsyncpa [#allocation6], 0 }
   0x5   :  { %16 = vsyncpa [#allocation6 + $0x1], 0 }
   0x6   :  { %17 = vsyncpa [#allocation9], 0 }
   0x7   :  { %19 = vsyncpa [#allocation9 + $0x1], 0 }
   0x8   :  { %20 = vsyncpa [#allocation4], 0 }
   0x9   :  { %22 = vsyncpa [#allocation4 + $0x1], 0 }
   0xa   :  { %23 = vsyncpa [#allocation12], 0 }
   0xb   :  { %25 = vsyncpa [#allocation12 + $0x1], 0  ;;  %s1184_s18 = smov 0   ;;  %s1186_s19 = smov 0  }
   0xc   :  { %s1188_s20 = smov 0   ;;  %s1190_s21 = smov 0  }
   0xd   :  { %s1192_s22 = smov 0   ;;  %s1194_s23 = smov 0  }
   0xe LB: > { %1533 = sst [smem:[#allocation18_spill]] %s1123_s18  ;;  %s1215_s24 = sadd.s32 4294967295, %s1143_s23   ;;  %s1143_s23 = sphi %s1194_s23, %s31_s23   ;;  %s1139_s22 = sphi %s1192_s22, %s1564_s22   ;;  %s1135_s21 = sphi %s1190_s21, %s1563_s21   ;;  %s1131_s20 = sphi %s1188_s20, %s1559_s20   ;;  %s1127_s19 = sphi %s1186_s19, %s1562_s19   ;;  %s1123_s18 = sphi %s1184_s18, %s1561_s18  }
   0xf   : > { %1534 = sst [smem:[#allocation19_spill]] %s1131_s20  ;;  %s771_s25 = sadd.s32 4294967294, %s1143_s23  }
  0x10   : > { %1535 = sst [smem:[#allocation20_spill]] %s1143_s23  ;;  %s43_s26 = sadd.s32 1, %s1139_s22 }
  0x11   : > { %s52_s27 = sadd.s32 1, %s1131_s20  ;;  %p45_p0 = scmp.ge.s32.totalorder %s43_s26, 8 }
  0x12   : > { %p59_p1 = scmp.ne.s32.totalorder %s1131_s20, %s1127_s19  ;;  %p60_p2 = scmp.eq.s32.totalorder %s1143_s23, 0 }
  0x13   : > { %p65_p3 = scmp.ne.s32.totalorder %s1127_s19, %s1123_s18  ;;  %s1566_s26 = smov (%p45_p0, %s43_s26), 0 }
  0x14   : > { %1536 = sst [smem:[#allocation21_spill]] %s1566_s26  ;;  %p1227_p4 = por %p60_p2, %p59_p1 }
  0x15   : > { %p66_p5 = scmp.eq.s32.totalorder %s1215_s24, 0  ;;  %s47_s29 = ssub.s32 %s1139_s22, %s1566_s26 }
  0x16   : > { %p171_p6 = scmp.eq.s32.totalorder %s1215_s24, 7  ;;  %p50_p7 = scmp.eq.s32.totalorder %s47_s29, 0 }
  0x17   : > { %p1235_p8 = por %p66_p5, %p65_p3  ;;  %p177_p10 = scmp.eq.s32.totalorder %s771_s25, 7 }
  0x18   : > { %p1239_p9 = por %p171_p6, %p59_p1  ;;  %p844_p12 = scmp.lt.s32.totalorder %s1143_s23, 8 }
  0x19   : > { %s1538_s30 = scalar_select %p1235_p8, 1, 0 }
  0x1a   : > { %s1539_s6 = scalar_select %p1239_p9, 1, 0 }
  0x1b   : > { %s1244_s7 = scalar_select %p50_p7, %s1131_s20, %s52_s27  }
  0x1c   : > { %p1246_p11 = por %p177_p10, %p65_p3  ;;  %s1252_s9 = sand.u32 1, %s1131_s20  }
  0x1d   : > { %1540 = sst [smem:[#allocation22_spill]] %s1244_s7  ;;  %s1255_s10 = sshll.u32 %s1252_s9, 3 }
  0x1e   : > { %s1541_s8 = scalar_select %p1246_p11, 1, 0 }
  0x1f   : > { %s1258_s11 = sshll.u32 %s1139_s22, 7  ;;  %p1262_p13 = pnand %p844_p12, %p1227_p4 }
  0x20   : > { %1542 = sst [smem:[#allocation23_spill]] %s1541_s8  ;;  %s244_s13 = sand.u32 1, %s1143_s23  }
  0x21   : > { %s1543_s12 = scalar_select %p1262_p13, 1, 0 }
  0x22   : > { %s1544_s1 = sld [smem:[#allocation24_spill]]  ;;  %s248_s17 = scalar_lea.vmem [#allocation5], %s1255_s10 }
  0x23   : > { %s255_s25 = sshll.u32 %s248_s17, 4  ;;  %s1278_s27 = scalar_lea.sflag [#allocation6], %s244_s13  ;;  %s1275_s25 = int_to_ptr.vmem [resolvable:$true] %s255_s25 }
  0x24   : > { %p1284_p3 = pneg %p1262_p13 }
  0x28   : > { %s1271_s16 = scalar_lea.hbm %s1544_s1, %s1258_s11  ;;  %s906_s17 = scalar_lea.hbm %s1544_s1, 1024 }
  0x29   : > { %s901_s28 = scalar_lea.hbm %s1271_s16, 128  ;;  %p907_p6 = scmp.lt.u32.totalorder %s1271_s16, %s1544_s1 }
  0x2a   : > { %p902_p2 = scmp.ne.s32.totalorder %s1271_s16, %s901_s28  ;;  %p908_p7 = scmp.lt.u32.totalorder %s906_s17, %s901_s28 }
  0x2b   : > { %p910_p12 = scmp.lt.u32.totalorder %s901_s28, %s1271_s16 }
  0x2c   : > { %p904_p4 = pnand %p1284_p3, %p902_p2  ;;  %p909_p10 = por %p908_p7, %p907_p6 }
  0x2e   : > { %p905_p5 = pneg %p904_p4  ;;  %p911_p0 = por %p910_p12, %p909_p10 }
  0x30   : > { %p912_p1 = pnand %p911_p0, %p905_p5 }
  0x32   : > { %915 = shalt.err (!%p912_p1)
}
  0x33   : > { %s916_s13 = scalar_lea.vmem %s1275_s25, 128  ;;  %s1145_s14 = smov [#allocation5]  }
  0x34   : > { %p917_p2 = scmp.ne.s32.totalorder %s1275_s25, %s916_s13  ;;  %s921_s15 = sshll.u32 %s1145_s14, 4  ;;  %s922_s15 = int_to_ptr.vmem [resolvable:$false] %s921_s15 }
  0x35   : > { %s923_s26 = scalar_lea.vmem %s922_s15, 256  ;;  %p924_p9 = scmp.lt.s32.totalorder %s1275_s25, %s922_s15 }
  0x36   : > { %p919_p4 = pnand %p917_p2, %p1284_p3  ;;  %p925_p8 = scmp.lt.s32.totalorder %s923_s26, %s916_s13 }
  0x38   : > { %p920_p11 = pneg %p919_p4  ;;  %p926_p6 = por %p925_p8, %p924_p9 }
  0x3a   : > { %p927_p7 = pnand %p926_p6, %p920_p11 }
  0x3c   : > { %930 = shalt.err (!%p927_p7)
}
  0x3d   : > { %830 = dma.hbm_to_vmem [thread:$0]  (!%p1262_p13), %s1271_s16, 128, %s1275_s25, %s1278_s27  }
  0x3e   : > { %p1546_p0 = scmp.lt.s32.totalorder %s1143_s23, 9  ;;  %p1547_p1 = scmp.ge.s32.totalorder %s1143_s23, 1 }
  0x3f   : > { %s1320_s13 = scalar_lea.hbm %s1516_s0, %s1258_s11  ;;  %s229_s14 = scalar_lea.vmem [#allocation2], %s1255_s10 }
  0x40   : > { %p1312_p5 = pnand %p1547_p1, %p1546_p0  ;;  %s237_s15 = sshll.u32 %s229_s14, 4  ;;  %s1323_s15 = int_to_ptr.vmem [resolvable:$true] %s237_s15 }
  0x41   : > { %s1329_s26 = scalar_lea.hbm %s1518_s2, %s1258_s11  ;;  %s226_s1 = scalar_lea.sflag [#allocation3], %s1252_s9 }
  0x42   : > { %s1548_s7 = scalar_select %p1312_p5, 1, 0 }
  0x43   : > { %s931_s20 = scalar_lea.hbm %s1320_s13, 128  ;;  %s936_s8 = scalar_lea.hbm %s1516_s0, 1024 }
  0x44   : > { %p932_p8 = scmp.ne.s32.totalorder %s1320_s13, %s931_s20  ;;  %p937_p10 = scmp.lt.u32.totalorder %s1320_s13, %s1516_s0 }
  0x45   : > { %p938_p12 = scmp.lt.u32.totalorder %s936_s8, %s931_s20  ;;  %p940_p4 = scmp.lt.u32.totalorder %s931_s20, %s1320_s13 }
  0x46   : > { %p934_p9 = pnand %p932_p8, %p1284_p3 }
  0x47   : > { %p939_p2 = por %p938_p12, %p937_p10 }
  0x48   : > { %p935_p11 = pneg %p934_p9 }
  0x49   : > { %p941_p6 = por %p940_p4, %p939_p2 }
  0x4b   : > { %p942_p7 = pnand %p941_p6, %p935_p11 }
  0x4d   : > { %945 = shalt.err (!%p942_p7)
}
  0x4e   : > { %s946_s11 = scalar_lea.vmem %s1323_s15, 128  ;;  %s1146_s14 = smov [#allocation2]  }
  0x4f   : > { %p947_p0 = scmp.ne.s32.totalorder %s1323_s15, %s946_s11  ;;  %s951_s16 = sshll.u32 %s1146_s14, 4  ;;  %s952_s16 = int_to_ptr.vmem [resolvable:$false] %s951_s16 }
  0x50   : > { %s953_s18 = scalar_lea.vmem %s952_s16, 256  ;;  %p954_p9 = scmp.lt.s32.totalorder %s1323_s15, %s952_s16 }
  0x51   : > { %p949_p1 = pnand %p947_p0, %p1284_p3  ;;  %p955_p5 = scmp.lt.s32.totalorder %s953_s18, %s946_s11 }
  0x53   : > { %p950_p8 = pneg %p949_p1  ;;  %p956_p10 = por %p955_p5, %p954_p9 }
  0x55   : > { %p957_p12 = pnand %p956_p10, %p950_p8 }
  0x57   : > { %960 = shalt.err (!%p957_p12)
}
  0x58   : > { %827 = dma.hbm_to_vmem [thread:$0]  (!%p1262_p13), %s1320_s13, 128, %s1323_s15, %s226_s1  }
  0x59   : > { %s266_s20 = scalar_lea.vmem [#allocation7], %s1255_s10  ;;  %s780_s8 = sshll.u32 %s1252_s9, 1 }
  0x5a   : > { %s273_s23 = sshll.u32 %s266_s20, 4  ;;  %s961_s25 = scalar_lea.hbm %s1329_s26, 128  ;;  %s274_s23 = int_to_ptr.vmem [resolvable:$true] %s273_s23 }
  0x5b   : > { %p962_p5 = scmp.ne.s32.totalorder %s1329_s26, %s961_s25  ;;  %s966_s11 = scalar_lea.hbm %s1518_s2, 1024 }
  0x5c   : > { %p967_p4 = scmp.lt.u32.totalorder %s1329_s26, %s1518_s2  ;;  %p968_p6 = scmp.lt.u32.totalorder %s966_s11, %s961_s25 }
  0x5d   : > { %p964_p11 = pnand %p962_p5, %p1284_p3  ;;  %p970_p0 = scmp.lt.u32.totalorder %s961_s25, %s1329_s26 }
  0x5e   : > { %p969_p7 = por %p968_p6, %p967_p4 }
  0x5f   : > { %p965_p2 = pneg %p964_p11 }
  0x60   : > { %p971_p1 = por %p970_p0, %p969_p7 }
  0x62   : > { %p972_p8 = pnand %p971_p1, %p965_p2 }
  0x64   : > { %975 = shalt.err (!%p972_p8)
}
  0x65   : > { %s976_s1 = scalar_lea.vmem %s274_s23, 128  ;;  %s1147_s10 = smov [#allocation7]  }
  0x66   : > { %p977_p9 = scmp.ne.s32.totalorder %s274_s23, %s976_s1  ;;  %s981_s13 = sshll.u32 %s1147_s10, 4  ;;  %s982_s13 = int_to_ptr.vmem [resolvable:$false] %s981_s13 }
  0x67   : > { %s983_s15 = scalar_lea.vmem %s982_s13, 256  ;;  %p984_p5 = scmp.lt.s32.totalorder %s274_s23, %s982_s13 }
  0x68   : > { %p979_p10 = pnand %p977_p9, %p1284_p3  ;;  %p985_p11 = scmp.lt.s32.totalorder %s983_s15, %s976_s1 }
  0x6a   : > { %p980_p12 = pneg %p979_p10  ;;  %p986_p13 = por %p985_p11, %p984_p5 }
  0x6c   : > { %p987_p4 = pnand %p986_p13, %p980_p12 }
  0x6e   : > { %990 = shalt.err (!%p987_p4)
}
  0x6f   : > { %p1549_p6 = scmp.ne.s32.totalorder %s1543_s12, 0  ;;  %s781_s18 = sshll.u32 %s1139_s22, 5 }
  0x70   : > { %s1377_s28 = scalar_lea.hbm %s1519_s3, %s781_s18  ;;  %s284_s17 = scalar_lea.vmem [#allocation8], %s780_s8 }
  0x71   : > { %833 = dma.hbm_to_vmem [thread:$0]  (!%p1549_p6), %s1329_s26, 128, %s274_s23, %s1278_s27  }
  0x72   : > { %s292_s11 = sshll.u32 %s284_s17, 4  ;;  %s281_s14 = scalar_lea.sflag [#allocation9], %s1252_s9  ;;  %s293_s11 = int_to_ptr.vmem [resolvable:$true] %s292_s11 }
  0x73   : > { %s991_s16 = scalar_lea.hbm %s1377_s28, 32  ;;  %s996_s23 = scalar_lea.hbm %s1519_s3, 256 }
  0x74   : > { %p992_p13 = scmp.ne.s32.totalorder %s1377_s28, %s991_s16  ;;  %p997_p0 = scmp.lt.u32.totalorder %s1377_s28, %s1519_s3 }
  0x75   : > { %p998_p1 = scmp.lt.u32.totalorder %s996_s23, %s991_s16  ;;  %p1000_p9 = scmp.lt.u32.totalorder %s991_s16, %s1377_s28 }
  0x76   : > { %p994_p2 = pnand %p992_p13, %p1284_p3 }
  0x77   : > { %p999_p8 = por %p998_p1, %p997_p0 }
  0x78   : > { %p995_p7 = pneg %p994_p2 }
  0x79   : > { %p1001_p10 = por %p1000_p9, %p999_p8 }
  0x7b   : > { %p1002_p12 = pnand %p1001_p10, %p995_p7 }
  0x7d   : > { %1005 = shalt.err (!%p1002_p12)
}
  0x7e   : > { %s1006_s9 = scalar_lea.vmem %s293_s11, 32  ;;  %s1148_s8 = smov [#allocation8]  }
  0x7f   : > { %p1007_p5 = scmp.ne.s32.totalorder %s293_s11, %s1006_s9  ;;  %s1011_s13 = sshll.u32 %s1148_s8, 4  ;;  %s1012_s13 = int_to_ptr.vmem [resolvable:$false] %s1011_s13 }
  0x80   : > { %s1013_s15 = scalar_lea.vmem %s1012_s13, 64  ;;  %p1014_p13 = scmp.lt.s32.totalorder %s293_s11, %s1012_s13 }
  0x81   : > { %p1009_p11 = pnand %p1007_p5, %p1284_p3  ;;  %p1015_p2 = scmp.lt.s32.totalorder %s1013_s15, %s1006_s9 }
  0x83   : > { %p1010_p4 = pneg %p1009_p11  ;;  %p1016_p6 = por %p1015_p2, %p1014_p13 }
  0x85   : > { %p1017_p0 = pnand %p1016_p6, %p1010_p4 }
  0x87   : > { %1020 = shalt.err (!%p1017_p0)
}
  0x88   : > { %p1550_p1 = scmp.ne.s32.totalorder %s1543_s12, 0  ;;  %p1551_p7 = scmp.ne.s32.totalorder %s1548_s7, 0 }
  0x89   : > { %s1402_s29 = sand.u32 (!%p1551_p7), 1, %s1127_s19   ;;  %p1552_p3 = scmp.ne.s32.totalorder (!%p1551_p7), %s1538_s30, 0 }
  0x8a   : > { %836 = dma.hbm_to_vmem [thread:$0]  (!%p1550_p1), %s1377_s28, 32, %s293_s11, %s281_s14  }
  0x8b   : > { %301 = sbr.rel (%p1551_p7) target bundleno = 912 (0x390), region = 36  ;;  %s1405_s18 = sshll.u32 (!%p1551_p7), %s1402_s29, 3 }
  0x8c   : > { %s304_s20 = scalar_lea.sflag (!%p1551_p7), [#allocation3], %s1402_s29  ;;  %s307_s25 = scalar_lea.vmem (!%p1551_p7), [#allocation2], %s1405_s18 }
  0x92   : > { %1102 = dma.done.wait (%p1552_p3), %s304_s20, 128  }
  0x93   : > { %1104 = vsyncadd (%p1552_p3), %s304_s20, 4294967168  ;;  %s312_s12 = sand.u32 1, %s1215_s24   ;;  %s316_s28 = scalar_lea.vmem [#allocation5], %s1405_s18 }
  0x94   : > { %s313_s7 = scalar_lea.sflag [#allocation6], %s312_s12 }
  0x95   : > { %1106 = dma.done.wait (%p1552_p3), %s313_s7, 256  }
  0x96   : > { %1108 = vsyncadd (%p1552_p3), %s313_s7, 4294967040  ;;  %s786_s17 = sshll.u32 %s1402_s29, 1  ;;  %s325_s11 = scalar_lea.vmem [#allocation7], %s1405_s18 }
  0x97   : > { %s331_s14 = scalar_lea.sflag [#allocation9], %s1402_s29  ;;  %s334_s16 = scalar_lea.vmem [#allocation8], %s786_s17 }
  0x98   : > { %1110 = dma.done.wait (%p1552_p3), %s331_s14, 32  }
  0x99   : > { %1112 = vsyncadd (%p1552_p3), %s331_s14, 4294967264  ;;  %v1149_v0 = vmov 0.0   ;;  %vm1150_vm0 = vmmov 0   ;;  %vm386_vm1 = vcmask 64512   ;;  %v385_v1 = vld [vmem:[%s316_s28] sm:$0xff]  ;;  %v383_v2 = vld [vmem:[%s307_s25] sm:$0xff] }
  0x9a   : > { %802 = vmatprep.subr.mxu0 %v1149_v0  ;;  %804 = vmatprep.mubr.msk.f32.mxu0 %vm1150_vm0, %v1149_v0  ;;  %v384_v3 = vmul.f32 0.35355338, %v383_v2  ;;  %v463_v4 = vld [vmem:[%s334_s16] sm:$0x3]  ;;  %v1151_v5 = vmov 0   ;;  %v481_v17 = vld [vmem:[%s325_s11] sm:$0xff] }
  0x9b   : > { %807 = vmatprep.subr.mxu1 %v1149_v0  ;;  %809 = vmatprep.mubr.msk.f32.mxu1 %vm1150_vm0, %v1149_v0  ;;  %vm464_vm2 = vnez %v463_v4  ;;  %s380_s24 = scalar_lea.vmem [#allocation11], %s1405_s18  ;;  %s794_s30 = sshll.u32 %s1135_s21, 7 }
  0x9c   : > { %803 = vmatpush3.xpose.msk.msra.mxu0 %vm386_vm1, %v385_v1  ;;  %v465_v6 = vsel %vm464_vm2, 16843009, %v1151_v5  ;;  %808 = vmatpush3.msra.mxu1 %v481_v17  ;;  %s1441_s23 = scalar_lea.hbm %s1521_s5, %s794_s30  ;;  %s590_s1 = sshll.u32 %s380_s24, 4  ;;  %s591_s1 = int_to_ptr.vmem [resolvable:$true] %s590_s1 }
  0x9d   : > { %v466_v7 = vunpack.c.0.s8 %v465_v6  ;;  %s562_s10 = scalar_lea.sflag [#allocation12], %s1402_s29  ;;  %s1021_s9 = scalar_lea.vmem %s591_s1, 128 }
  0x9e   : > { %p1022_p6 = scmp.ne.s32.totalorder %s591_s1, %s1021_s9  ;;  %p1553_p8 = scmp.ne.s32.totalorder %s1539_s6, 0 }
  0x9f   : > { %805 = vmatmul.mubr.msk.f32.vlgmr.msra.gmra.mrb[0].mxu0 %vm386_vm1, %v384_v3  ;;  %vm467_vm3 = vcmp.ne.s32.totalorder %v466_v7, 0  ;;  %s1152_s8 = smov [#allocation11]  }
  0xa0   : > { %p1023_p9 = pnand %p1022_p6, %p1553_p8  ;;  %s1025_s13 = sshll.u32 %s1152_s8, 4  ;;  %s1026_s13 = int_to_ptr.vmem [resolvable:$false] %s1025_s13 }
  0xa1   : > { %s1027_s15 = scalar_lea.vmem %s1026_s13, 256  ;;  %p1028_p12 = scmp.lt.s32.totalorder %s591_s1, %s1026_s13 }
  0xa2   : > { %p1024_p10 = pneg %p1023_p9  ;;  %p1029_p5 = scmp.lt.s32.totalorder %s1027_s15, %s1021_s9 }
  0xa4   : > { %p1030_p11 = por %p1029_p5, %p1028_p12 }
  0xa6   : > { %p1031_p4 = pnand %p1030_p11, %p1024_p10 }
 0x172   : > { %v459_v8 = vpop.f32.mrb[0].mxu0 }
 0x173   : > { %v468_v9 = vsel %vm467_vm3, -1e+09, %v459_v8  ;;  %v806_v10 = vpop.f32.mrb[1].mxu0 }
 0x174   : > { %v469_v11 = vsel %vm386_vm1, %v468_v9, -inf }
 0x175   : > { %470 = vmax.xlane.f32.xlu0 %v469_v11 }
 0x202   : > { %v471_v12 = vpop.xlane.xlu0 %470 }
 0x203   : > { %v472_v13 = vsub.f32 %v468_v9, %v471_v12 }
 0x205   : > { %v473_v14 = vmul.f32 1.442695, %v472_v13 }
 0x207   : > { %897 = vpow2.f32 %v473_v14 }
 0x211   : > { %v898_v15 = vpop.eup %897 }
 0x212   : > { %v475_v16 = vsel %vm386_vm1, %v898_v15, 0.0 }
 0x213   : > { %476 = vadd.xlane.f32.xlu0 %v475_v16 }
 0x2a0   : > { %v477_v18 = vpop.xlane.xlu0 %476 }
 0x2a1   : > { %899 = vrcp.f32 %v477_v18 }
 0x2ab   : > { %v900_v19 = vpop.eup %899 }
 0x2ac   : > { %v479_v20 = vmul.f32 %v900_v19, %v898_v15 }
 0x2ae   : > { %810 = vmatmul.mubr.msk.f32.vlgmr.msra.gmra.mrb[0].mxu1 %vm386_vm1, %v479_v20  ;;  %480 = vst.msk [vmem:[%s380_s24] sm:$0xff] %vm386_vm1, %v479_v20 }
 0x2af   : > { %1034 = shalt.err (!%p1031_p4)
}
 0x2b0   : > { %s1035_s20 = scalar_lea.hbm %s1441_s23, 128  ;;  %s1039_s7 = scalar_lea.hbm %s1521_s5, 1024 }
 0x2b1   : > { %p1036_p13 = scmp.ne.s32.totalorder %s1441_s23, %s1035_s20  ;;  %p1040_p1 = scmp.lt.u32.totalorder %s1441_s23, %s1521_s5 }
 0x2b2   : > { %p1041_p7 = scmp.lt.u32.totalorder %s1039_s7, %s1035_s20  ;;  %p1043_p6 = scmp.lt.u32.totalorder %s1035_s20, %s1441_s23 }
 0x2b3   : > { %p1037_p2 = pnand %p1036_p13, %p1553_p8 }
 0x2b4   : > { %p1042_p3 = por %p1041_p7, %p1040_p1 }
 0x2b5   : > { %p1038_p0 = pneg %p1037_p2 }
 0x2b6   : > { %p1044_p9 = por %p1043_p6, %p1042_p3 }
 0x2b8   : > { %p1045_p10 = pnand %p1044_p9, %p1038_p0 }
 0x2ba   : > { %1048 = shalt.err (!%p1045_p10)
}
 0x2bb   : > { %821 = dma.vmem_to_hbm [thread:$0]  (%p1553_p8), %s591_s1, 128, %s1441_s23, %s562_s10  }
 0x2bc   : > { %s373_s11 = scalar_lea.vmem [#allocation10], %s1405_s18  ;;  %s1467_s27 = scalar_lea.hbm %s1520_s4, %s794_s30 }
 0x2bd   : > { %s576_s14 = sshll.u32 %s373_s11, 4  ;;  %s557_s26 = scalar_lea.sflag [#allocation4], %s1402_s29  ;;  %s1469_s14 = int_to_ptr.vmem [resolvable:$true] %s576_s14 }
 0x2be   : > { %s1049_s9 = scalar_lea.vmem %s1469_s14, 128  ;;  %s1153_s21 = smov [#allocation10]  }
 0x2bf   : > { %p1050_p12 = scmp.ne.s32.totalorder %s1469_s14, %s1049_s9  ;;  %s1053_s18 = sshll.u32 %s1153_s21, 4  ;;  %s1054_s18 = int_to_ptr.vmem [resolvable:$false] %s1053_s18 }
 0x2c0   : > { %s1055_s30 = scalar_lea.vmem %s1054_s18, 256  ;;  %p1056_p4 = scmp.lt.s32.totalorder %s1469_s14, %s1054_s18 }
 0x2c1   : > { %p1051_p5 = pnand %p1050_p12, %p1553_p8  ;;  %p1057_p13 = scmp.lt.s32.totalorder %s1055_s30, %s1049_s9 }
 0x2c3   : > { %p1052_p11 = pneg %p1051_p5  ;;  %p1058_p2 = por %p1057_p13, %p1056_p4 }
 0x2c5   : > { %p1059_p0 = pnand %p1058_p2, %p1052_p11 }
 0x381   : > { %v551_v21 = vpop.f32.mrb[0].mxu1 }
 0x382   : > { %555 = vst.msk [vmem:[%s373_s11] sm:$0xff] %vm386_vm1, %v551_v21  ;;  %v811_v22 = vpop.f32.mrb[1].mxu1 }
 0x383   : > { %1062 = shalt.err (!%p1059_p0)
}
 0x384   : > { %s1063_s29 = scalar_lea.hbm %s1467_s27, 128  ;;  %s1067_s10 = scalar_lea.hbm %s1520_s4, 1024 }
 0x385   : > { %p1064_p1 = scmp.ne.s32.totalorder %s1467_s27, %s1063_s29  ;;  %p1068_p6 = scmp.lt.u32.totalorder %s1467_s27, %s1520_s4 }
 0x386   : > { %p1069_p9 = scmp.lt.u32.totalorder %s1067_s10, %s1063_s29  ;;  %p1071_p12 = scmp.lt.u32.totalorder %s1063_s29, %s1467_s27 }
 0x387   : > { %p1065_p7 = pnand %p1064_p1, %p1553_p8 }
 0x388   : > { %p1070_p10 = por %p1069_p9, %p1068_p6 }
 0x389   : > { %p1066_p3 = pneg %p1065_p7 }
 0x38a   : > { %p1072_p5 = por %p1071_p12, %p1070_p10 }
 0x38c   : > { %p1073_p11 = pnand %p1072_p5, %p1066_p3 }
 0x38e   : > { %1076 = shalt.err (!%p1073_p11)
}
 0x38f   : > { %820 = dma.vmem_to_hbm [thread:$0]  (%p1553_p8), %s1469_s14, 128, %s1467_s27, %s557_s26  }
 0x390 PF: > { %s1554_s15 = sld [smem:[#allocation20_spill]]  ;;  %s1555_s20 = sld [smem:[#allocation18_spill]] }
 0x391   : > { %s1556_s25 = sld [smem:[#allocation23_spill]] }
 0x396   : > { %p845_p4 = scmp.ge.s32.totalorder %s1554_s15, 2  ;;  %s602_s12 = sand.u32 1, %s1555_s20  }
 0x397   : > { %p1557_p13 = scmp.ne.s32.totalorder %s1556_s25, 0  ;;  %s603_s7 = scalar_lea.sflag [#allocation4], %s602_s12 }
 0x399   : > { %p838_p2 = pnand %p845_p4, %p1557_p13 }
 0x39b   : > { %1114 = dma.done.wait (!%p838_p2), %s603_s7, 128  }
 0x39c   : > { %1116 = vsyncadd (!%p838_p2), %s603_s7, 4294967168  ;;  %s612_s28 = scalar_lea.sflag [#allocation12], %s602_s12 }
 0x39d   : > { %1118 = dma.done.wait (!%p838_p2), %s612_s28, 128  }
 0x39e   : > { %1120 = vsyncadd (!%p838_p2), %s612_s28, 4294967168  ;;  %s31_s23 = sadd.s32 1, %s1554_s15   ;;  %s1558_s6 = sld [smem:[#allocation19_spill]] }
 0x39f   : > { %p28_p0 = scmp.ge.s32.totalorder %s31_s23, 10   ;;  %s1559_s20 = sld [smem:[#allocation22_spill]] }
 0x3a0   : > { %s1560_s17 = sld [smem:[#allocation21_spill]]  ;;  %s1561_s18 = smov %s1127_s19 }
 0x3a1   : > { %s1563_s21 = smov %s1139_s22  ;;  %30 = sbr.rel (!%p28_p0) target bundleno = 14 (0xe), region = 135 }
 0x3a4   : > { %s1562_s19 = smov %s1558_s6 }
 0x3a6   : > { %s1564_s22 = smov %s1560_s17 }
 0x3a8   :  { %617 = vsyncpa [#allocation3], 1 }
 0x3a9   :  { %619 = vsyncpa [#allocation3 + $0x1], 1 }
 0x3aa   :  { %620 = vsyncpa [#allocation6], 1 }
 0x3ab   :  { %622 = vsyncpa [#allocation6 + $0x1], 1 }
 0x3ac   :  { %623 = vsyncpa [#allocation9], 1 }
 0x3ad   :  { %625 = vsyncpa [#allocation9 + $0x1], 1 }
 0x3ae   :  { %626 = vsyncpa [#allocation4], 1 }
 0x3af   :  { %628 = vsyncpa [#allocation4 + $0x1], 1 }
 0x3b0   :  { %629 = vsyncpa [#allocation12], 1 }
 0x3b1   :  { %631 = vsyncpa [#allocation12 + $0x1], 1 }

</bundles_post_ra>
